<compile_context>
chip_gen: v7x
topology: tpu7x:2x2x1
jax: 0.10.0
libtpu: 0.0.40
codegen_flags: <defaults>
</compile_context>

<pallas_src>
import jax
import jax.numpy as jnp
from jax.experimental import pallas as pl
from jax.experimental.pallas import tpu as pltpu

EPS = 1e-5


def _stock_return_kernel(x_ref, w_ref, gb_ref, o_ref):
    # x_ref : [Bblk, N, F_in]   activations for Bblk cross-sections
    # w_ref : [F_out, F_in]     nn.Linear weight (resident across the grid)
    # gb_ref: [F_out, 2]        col 0 = gamma, col 1 = beta (resident)
    # o_ref : [Bblk, N, F_out]  BN(x @ W.T)
    w = w_ref[...]
    gamma = gb_ref[:, 0:1]                 # [F_out, 1]
    beta = gb_ref[:, 1:2]                  # [F_out, 1]
    n = x_ref.shape[1]
    inv_n = 1.0 / n

    def body(b, carry):
        xb = x_ref[b]                                          # [N, F_in]
        # Lane-dense matmul: contract over F_in, no wrapper transpose needed.
        #   [F_out, F_in] . [N, F_in]^T -> [F_out, N]
        y = jax.lax.dot_general(
            w, xb,
            dimension_numbers=(((1,), (1,)), ((), ())),
            preferred_element_type=jnp.float32,
        )                                                      # [F_out, N]

        # BatchNorm1d (training mode) stats over the N stocks of this
        # cross-section.  One-pass form: both lane reductions go to the XLU
        # back-to-back; var = E[y^2] - mean^2 (biased, as BN uses).
        sum_y = jnp.sum(y, axis=1, keepdims=True)              # [F_out, 1]
        sum_y2 = jnp.sum(y * y, axis=1, keepdims=True)         # [F_out, 1]
        mean = sum_y * inv_n
        var = sum_y2 * inv_n - mean * mean
        inv_std = jax.lax.rsqrt(var + EPS)                     # EUP

        scale = gamma * inv_std                                # [F_out, 1]
        shift = beta - mean * scale                            # [F_out, 1]
        out = y * scale + shift                                # [F_out, N]

        # In-kernel XLU transpose -> [N, F_out]; avoids a separate XLA
        # transpose op + extra HBM round trip in the wrapper.
        o_ref[b] = out.T.astype(o_ref.dtype)
        return carry

    jax.lax.fori_loop(0, x_ref.shape[0], body, 0, unroll=True)


def _choose_bblk(B, N, F_in, F_out):
    """Cross-sections per grid step.

    Cap the per-step working set (double-buffered input + resident output +
    [F_out, N] intermediate) at ~8 MiB so it fits comfortably under the v5e
    16 MiB scoped-VMEM default and v7x's 64 MiB physical VMEM.  Prefer 2 grid
    steps when possible so v7x's two TensorCores each take half the batch.
    """
    per_cs_bytes = 4 * N * (F_in + 2 * F_out)
    cap = max(1, (8 * 1024 * 1024) // (2 * per_cs_bytes))
    target = B if B < 2 else (B + 1) // 2
    bblk = max(1, min(target, cap))
    while B % bblk != 0:            # shrink to a divisor of B
        bblk -= 1
    return bblk


def stock_return_pred_forward(x, w, gamma, beta):
    """Forward of StockReturn_pred_Model for B cross-sections.

    x:     [B, N, F_in] (or [N, F_in] for a single cross-section), float32
    w:     [F_out, F_in]  (nn.Linear weight, bias=False)
    gamma: [F_out]        (BatchNorm1d weight)
    beta:  [F_out]        (BatchNorm1d bias)
    returns [B, N, F_out] (or [N, F_out]).
    """
    single = x.ndim == 2
    if single:
        x = x[None]
    B, N, F_in = x.shape
    F_out = w.shape[0]

    x = x.astype(jnp.float32)
    w = w.astype(jnp.float32)
    # Pack gamma/beta into one operand -> one fewer DMA stream.
    gb = jnp.stack(
        [gamma.astype(jnp.float32), beta.astype(jnp.float32)], axis=1
    )                                                           # [F_out, 2]

    bblk = _choose_bblk(B, N, F_in, F_out)
    grid = (B // bblk,)

    cost = pl.CostEstimate(
        flops=2 * B * N * F_in * F_out,
        transcendentals=B * F_out,  # rsqrt per feature per cross-section
        bytes_accessed=4 * (B * N * F_in + F_out * F_in + 2 * F_out
                            + B * N * F_out),
    )

    out = pl.pallas_call(
        _stock_return_kernel,
        out_shape=jax.ShapeDtypeStruct((B, N, F_out), jnp.float32),
        grid_spec=pl.GridSpec(
            grid=grid,
            in_specs=[
                # per-step slab of cross-sections
                pl.BlockSpec((bblk, N, F_in), lambda g: (g, 0, 0)),
                # weights / BN params: same block every step -> VMEM resident
                pl.BlockSpec((F_out, F_in), lambda g: (0, 0)),
                pl.BlockSpec((F_out, 2), lambda g: (0, 0)),
            ],
            out_specs=pl.BlockSpec((bblk, N, F_out), lambda g: (g, 0, 0)),
        ),
        compiler_params=pltpu.CompilerParams(
            # Independent cross-sections: shard the (<=2-step) grid across
            # TensorCores on v7x; harmless on single-TC v5e/v6e.
            dimension_semantics=("parallel",),
            # Explicit scoped-VMEM headroom (v5e default is only 16 MiB).
            vmem_limit_bytes=32 * 1024 * 1024,
        ),
        cost_estimate=cost,
    )(x, w, gb)

    if single:
        out = out[0]
    return out


def reference_forward(x, w, gamma, beta):
    """Pure-JAX reference matching nn.Linear(bias=False) + BatchNorm1d(train)."""
    y = jnp.einsum("bnk,ok->bno", x, w)
    mean = y.mean(axis=1, keepdims=True)
    var = ((y - mean) ** 2).mean(axis=1, keepdims=True)  # biased, as BN uses
    g = gamma.reshape(1, 1, -1)
    b = beta.reshape(1, 1, -1)
    return g * (y - mean) / jnp.sqrt(var + EPS) + b


if __name__ == "__main__":
    # Small shapes consistent with the module: B cross-sections (time steps),
    # N stocks each, input_factor_number features in, output_factor_number out.
    B = 8
    N = 128
    input_factor_number = 32
    output_factor_number = 16

    key = jax.random.PRNGKey(0)
    kx, kw = jax.random.split(key)

    x = jax.random.normal(kx, (B, N, input_factor_number), dtype=jnp.float32)

    # nn.Linear weight is [F_out, F_in]; deterministic init.
    w = jax.random.normal(
        kw, (output_factor_number, input_factor_number), dtype=jnp.float32
    ) * (1.0 / jnp.sqrt(input_factor_number))

    # BatchNorm1d affine params (PyTorch defaults: gamma=1, beta=0).
    gamma = jnp.ones((output_factor_number,), dtype=jnp.float32)
    beta = jnp.zeros((output_factor_number,), dtype=jnp.float32)

    out = stock_return_pred_forward(x, w, gamma, beta)
    out = jax.block_until_ready(out)

    ref = reference_forward(x, w, gamma, beta)
    assert out.shape == (B, N, output_factor_number)
    # Default (single-pass) MXU precision in the kernel vs XLA's default
    # matmul precision in the reference -> tolerance relaxed vs the old
    # Precision.HIGHEST setup.
    assert jnp.allclose(out, ref, atol=5e-2, rtol=5e-2), "mismatch vs reference"

    # Single-cross-section path (matches the original module's forward(x)).
    out1 = jax.block_until_ready(stock_return_pred_forward(x[0], w, gamma, beta))
    assert out1.shape == (N, output_factor_number)
    assert jnp.allclose(out1, ref[0], atol=5e-2, rtol=5e-2), "single-batch mismatch"

    print("KERNEL_OK")
</pallas_src>

<mosaic_0001>
module attributes {stable_mosaic.version = 11 : i64} {
  func.func @_stock_return_kernel(%arg0: i32, %arg1: memref<4x128x32xf32, #tpu.memory_space<vmem>>, %arg2: memref<16x32xf32, #tpu.memory_space<vmem>>, %arg3: memref<16x2xf32, #tpu.memory_space<vmem>>, %arg4: memref<4x128x16xf32, #tpu.memory_space<vmem>>) attributes {dimension_semantics = [#tpu.dimension_semantics<parallel>], iteration_bounds = array<i64: 2>, scalar_prefetch = 0 : i64, scratch_operands = 0 : i64, tpu.core_type = #tpu.core_type<tc>, window_params = [{transform_indices = @transform_0, window_bounds = array<i64: 4, 128, 32>}, {pipeline_mode = #tpu.pipeline_mode<synchronous>, transform_indices = @transform_1, window_bounds = array<i64: 16, 32>}, {pipeline_mode = #tpu.pipeline_mode<synchronous>, transform_indices = @transform_2, window_bounds = array<i64: 16, 2>}, {transform_indices = @transform_3, window_bounds = array<i64: 4, 128, 16>}]} {
    %c0 = arith.constant 0 : index
    %c0_0 = arith.constant 0 : index
    %0 = vector.load %arg2[%c0, %c0_0] : memref<16x32xf32, #tpu.memory_space<vmem>>, vector<16x32xf32>
    %c0_1 = arith.constant 0 : index
    %c0_2 = arith.constant 0 : index
    %1 = vector.load %arg3[%c0_1, %c0_2] : memref<16x2xf32, #tpu.memory_space<vmem>>, vector<16x1xf32>
    %c0_3 = arith.constant 0 : index
    %c1 = arith.constant 1 : index
    %2 = vector.load %arg3[%c0_3, %c1] : memref<16x2xf32, #tpu.memory_space<vmem>>, vector<16x1xf32>
    %c0_i32 = arith.constant 0 : i32
    %3 = arith.index_cast %c0_i32 : i32 to index
    %c0_4 = arith.constant 0 : index
    %c0_5 = arith.constant 0 : index
    %4 = vector.load %arg1[%3, %c0_4, %c0_5] : memref<4x128x32xf32, #tpu.memory_space<vmem>>, vector<1x128x32xf32>
    %5 = vector.shape_cast %4 : vector<1x128x32xf32> to vector<128x32xf32>
    %cst = arith.constant dense<0.000000e+00> : vector<16x128xf32>
    %6 = tpu.matmul %0, %5, %cst {dimension_numbers = #tpu.dot_dimension_numbers<[1], [1], [0], [0], [0, 0, 1, 0], [], []>} : vector<16x32xf32>, vector<128x32xf32>, vector<16x128xf32> -> vector<16x128xf32>
    %cst_6 = arith.constant dense<0.000000e+00> : vector<16xf32>
    %7 = vector.multi_reduction <add>, %6, %cst_6 [1] : vector<16x128xf32> to vector<16xf32>
    %8 = vector.shape_cast %7 : vector<16xf32> to vector<16x1xf32>
    %9 = arith.mulf %6, %6 : vector<16x128xf32>
    %cst_7 = arith.constant dense<0.000000e+00> : vector<16xf32>
    %10 = vector.multi_reduction <add>, %9, %cst_7 [1] : vector<16x128xf32> to vector<16xf32>
    %11 = vector.shape_cast %10 : vector<16xf32> to vector<16x1xf32>
    %cst_8 = arith.constant 7.812500e-03 : f32
    %12 = vector.broadcast %cst_8 : f32 to vector<16x1xf32>
    %13 = arith.mulf %8, %12 : vector<16x1xf32>
    %cst_9 = arith.constant 7.812500e-03 : f32
    %14 = vector.broadcast %cst_9 : f32 to vector<16x1xf32>
    %15 = arith.mulf %11, %14 : vector<16x1xf32>
    %16 = arith.mulf %13, %13 : vector<16x1xf32>
    %17 = arith.subf %15, %16 : vector<16x1xf32>
    %cst_10 = arith.constant 9.99999974E-6 : f32
    %18 = vector.broadcast %cst_10 : f32 to vector<16x1xf32>
    %19 = arith.addf %17, %18 : vector<16x1xf32>
    %20 = math.rsqrt %19 : vector<16x1xf32>
    %21 = arith.mulf %1, %20 : vector<16x1xf32>
    %22 = arith.mulf %13, %21 : vector<16x1xf32>
    %23 = arith.subf %2, %22 : vector<16x1xf32>
    %24 = vector.broadcast %21 : vector<16x1xf32> to vector<16x128xf32>
    %25 = arith.mulf %6, %24 : vector<16x128xf32>
    %26 = vector.broadcast %23 : vector<16x1xf32> to vector<16x128xf32>
    %27 = arith.addf %25, %26 : vector<16x128xf32>
    %28 = tpu.transpose %27, [1, 0] : vector<16x128xf32> -> vector<128x16xf32>
    %29 = arith.index_cast %c0_i32 : i32 to index
    %c0_11 = arith.constant 0 : index
    %c0_12 = arith.constant 0 : index
    %30 = vector.load %arg4[%29, %c0_11, %c0_12] : memref<4x128x16xf32, #tpu.memory_space<vmem>>, vector<1x128x16xf32>
    %31 = vector.shape_cast %30 : vector<1x128x16xf32> to vector<128x16xf32>
    %32 = vector.shape_cast %28 : vector<128x16xf32> to vector<1x128x16xf32>
    tpu.vector_store %arg4[%29, %c0_11, %c0_12], %32 {strides = array<i32>} : memref<4x128x16xf32, #tpu.memory_space<vmem>>, vector<1x128x16xf32>,
    %c1_i32 = arith.constant 1 : i32
    %33 = arith.index_cast %c1_i32 : i32 to index
    %c0_13 = arith.constant 0 : index
    %c0_14 = arith.constant 0 : index
    %34 = vector.load %arg1[%33, %c0_13, %c0_14] : memref<4x128x32xf32, #tpu.memory_space<vmem>>, vector<1x128x32xf32>
    %35 = vector.shape_cast %34 : vector<1x128x32xf32> to vector<128x32xf32>
    %cst_15 = arith.constant dense<0.000000e+00> : vector<16x128xf32>
    %36 = tpu.matmul %0, %35, %cst_15 {dimension_numbers = #tpu.dot_dimension_numbers<[1], [1], [0], [0], [0, 0, 1, 0], [], []>} : vector<16x32xf32>, vector<128x32xf32>, vector<16x128xf32> -> vector<16x128xf32>
    %cst_16 = arith.constant dense<0.000000e+00> : vector<16xf32>
    %37 = vector.multi_reduction <add>, %36, %cst_16 [1] : vector<16x128xf32> to vector<16xf32>
    %38 = vector.shape_cast %37 : vector<16xf32> to vector<16x1xf32>
    %39 = arith.mulf %36, %36 : vector<16x128xf32>
    %cst_17 = arith.constant dense<0.000000e+00> : vector<16xf32>
    %40 = vector.multi_reduction <add>, %39, %cst_17 [1] : vector<16x128xf32> to vector<16xf32>
    %41 = vector.shape_cast %40 : vector<16xf32> to vector<16x1xf32>
    %cst_18 = arith.constant 7.812500e-03 : f32
    %42 = vector.broadcast %cst_18 : f32 to vector<16x1xf32>
    %43 = arith.mulf %38, %42 : vector<16x1xf32>
    %cst_19 = arith.constant 7.812500e-03 : f32
    %44 = vector.broadcast %cst_19 : f32 to vector<16x1xf32>
    %45 = arith.mulf %41, %44 : vector<16x1xf32>
    %46 = arith.mulf %43, %43 : vector<16x1xf32>
    %47 = arith.subf %45, %46 : vector<16x1xf32>
    %cst_20 = arith.constant 9.99999974E-6 : f32
    %48 = vector.broadcast %cst_20 : f32 to vector<16x1xf32>
    %49 = arith.addf %47, %48 : vector<16x1xf32>
    %50 = math.rsqrt %49 : vector<16x1xf32>
    %51 = arith.mulf %1, %50 : vector<16x1xf32>
    %52 = arith.mulf %43, %51 : vector<16x1xf32>
    %53 = arith.subf %2, %52 : vector<16x1xf32>
    %54 = vector.broadcast %51 : vector<16x1xf32> to vector<16x128xf32>
    %55 = arith.mulf %36, %54 : vector<16x128xf32>
    %56 = vector.broadcast %53 : vector<16x1xf32> to vector<16x128xf32>
    %57 = arith.addf %55, %56 : vector<16x128xf32>
    %58 = tpu.transpose %57, [1, 0] : vector<16x128xf32> -> vector<128x16xf32>
    %59 = arith.index_cast %c1_i32 : i32 to index
    %c0_21 = arith.constant 0 : index
    %c0_22 = arith.constant 0 : index
    %60 = vector.load %arg4[%59, %c0_21, %c0_22] : memref<4x128x16xf32, #tpu.memory_space<vmem>>, vector<1x128x16xf32>
    %61 = vector.shape_cast %60 : vector<1x128x16xf32> to vector<128x16xf32>
    %62 = vector.shape_cast %58 : vector<128x16xf32> to vector<1x128x16xf32>
    tpu.vector_store %arg4[%59, %c0_21, %c0_22], %62 {strides = array<i32>} : memref<4x128x16xf32, #tpu.memory_space<vmem>>, vector<1x128x16xf32>,
    %c2_i32 = arith.constant 2 : i32
    %63 = arith.index_cast %c2_i32 : i32 to index
    %c0_23 = arith.constant 0 : index
    %c0_24 = arith.constant 0 : index
    %64 = vector.load %arg1[%63, %c0_23, %c0_24] : memref<4x128x32xf32, #tpu.memory_space<vmem>>, vector<1x128x32xf32>
    %65 = vector.shape_cast %64 : vector<1x128x32xf32> to vector<128x32xf32>
    %cst_25 = arith.constant dense<0.000000e+00> : vector<16x128xf32>
    %66 = tpu.matmul %0, %65, %cst_25 {dimension_numbers = #tpu.dot_dimension_numbers<[1], [1], [0], [0], [0, 0, 1, 0], [], []>} : vector<16x32xf32>, vector<128x32xf32>, vector<16x128xf32> -> vector<16x128xf32>
    %cst_26 = arith.constant dense<0.000000e+00> : vector<16xf32>
    %67 = vector.multi_reduction <add>, %66, %cst_26 [1] : vector<16x128xf32> to vector<16xf32>
    %68 = vector.shape_cast %67 : vector<16xf32> to vector<16x1xf32>
    %69 = arith.mulf %66, %66 : vector<16x128xf32>
    %cst_27 = arith.constant dense<0.000000e+00> : vector<16xf32>
    %70 = vector.multi_reduction <add>, %69, %cst_27 [1] : vector<16x128xf32> to vector<16xf32>
    %71 = vector.shape_cast %70 : vector<16xf32> to vector<16x1xf32>
    %cst_28 = arith.constant 7.812500e-03 : f32
    %72 = vector.broadcast %cst_28 : f32 to vector<16x1xf32>
    %73 = arith.mulf %68, %72 : vector<16x1xf32>
    %cst_29 = arith.constant 7.812500e-03 : f32
    %74 = vector.broadcast %cst_29 : f32 to vector<16x1xf32>
    %75 = arith.mulf %71, %74 : vector<16x1xf32>
    %76 = arith.mulf %73, %73 : vector<16x1xf32>
    %77 = arith.subf %75, %76 : vector<16x1xf32>
    %cst_30 = arith.constant 9.99999974E-6 : f32
    %78 = vector.broadcast %cst_30 : f32 to vector<16x1xf32>
    %79 = arith.addf %77, %78 : vector<16x1xf32>
    %80 = math.rsqrt %79 : vector<16x1xf32>
    %81 = arith.mulf %1, %80 : vector<16x1xf32>
    %82 = arith.mulf %73, %81 : vector<16x1xf32>
    %83 = arith.subf %2, %82 : vector<16x1xf32>
    %84 = vector.broadcast %81 : vector<16x1xf32> to vector<16x128xf32>
    %85 = arith.mulf %66, %84 : vector<16x128xf32>
    %86 = vector.broadcast %83 : vector<16x1xf32> to vector<16x128xf32>
    %87 = arith.addf %85, %86 : vector<16x128xf32>
    %88 = tpu.transpose %87, [1, 0] : vector<16x128xf32> -> vector<128x16xf32>
    %89 = arith.index_cast %c2_i32 : i32 to index
    %c0_31 = arith.constant 0 : index
    %c0_32 = arith.constant 0 : index
    %90 = vector.load %arg4[%89, %c0_31, %c0_32] : memref<4x128x16xf32, #tpu.memory_space<vmem>>, vector<1x128x16xf32>
    %91 = vector.shape_cast %90 : vector<1x128x16xf32> to vector<128x16xf32>
    %92 = vector.shape_cast %88 : vector<128x16xf32> to vector<1x128x16xf32>
    tpu.vector_store %arg4[%89, %c0_31, %c0_32], %92 {strides = array<i32>} : memref<4x128x16xf32, #tpu.memory_space<vmem>>, vector<1x128x16xf32>,
    %c3_i32 = arith.constant 3 : i32
    %93 = arith.index_cast %c3_i32 : i32 to index
    %c0_33 = arith.constant 0 : index
    %c0_34 = arith.constant 0 : index
    %94 = vector.load %arg1[%93, %c0_33, %c0_34] : memref<4x128x32xf32, #tpu.memory_space<vmem>>, vector<1x128x32xf32>
    %95 = vector.shape_cast %94 : vector<1x128x32xf32> to vector<128x32xf32>
    %cst_35 = arith.constant dense<0.000000e+00> : vector<16x128xf32>
    %96 = tpu.matmul %0, %95, %cst_35 {dimension_numbers = #tpu.dot_dimension_numbers<[1], [1], [0], [0], [0, 0, 1, 0], [], []>} : vector<16x32xf32>, vector<128x32xf32>, vector<16x128xf32> -> vector<16x128xf32>
    %cst_36 = arith.constant dense<0.000000e+00> : vector<16xf32>
    %97 = vector.multi_reduction <add>, %96, %cst_36 [1] : vector<16x128xf32> to vector<16xf32>
    %98 = vector.shape_cast %97 : vector<16xf32> to vector<16x1xf32>
    %99 = arith.mulf %96, %96 : vector<16x128xf32>
    %cst_37 = arith.constant dense<0.000000e+00> : vector<16xf32>
    %100 = vector.multi_reduction <add>, %99, %cst_37 [1] : vector<16x128xf32> to vector<16xf32>
    %101 = vector.shape_cast %100 : vector<16xf32> to vector<16x1xf32>
    %cst_38 = arith.constant 7.812500e-03 : f32
    %102 = vector.broadcast %cst_38 : f32 to vector<16x1xf32>
    %103 = arith.mulf %98, %102 : vector<16x1xf32>
    %cst_39 = arith.constant 7.812500e-03 : f32
    %104 = vector.broadcast %cst_39 : f32 to vector<16x1xf32>
    %105 = arith.mulf %101, %104 : vector<16x1xf32>
    %106 = arith.mulf %103, %103 : vector<16x1xf32>
    %107 = arith.subf %105, %106 : vector<16x1xf32>
    %cst_40 = arith.constant 9.99999974E-6 : f32
    %108 = vector.broadcast %cst_40 : f32 to vector<16x1xf32>
    %109 = arith.addf %107, %108 : vector<16x1xf32>
    %110 = math.rsqrt %109 : vector<16x1xf32>
    %111 = arith.mulf %1, %110 : vector<16x1xf32>
    %112 = arith.mulf %103, %111 : vector<16x1xf32>
    %113 = arith.subf %2, %112 : vector<16x1xf32>
    %114 = vector.broadcast %111 : vector<16x1xf32> to vector<16x128xf32>
    %115 = arith.mulf %96, %114 : vector<16x128xf32>
    %116 = vector.broadcast %113 : vector<16x1xf32> to vector<16x128xf32>
    %117 = arith.addf %115, %116 : vector<16x128xf32>
    %118 = tpu.transpose %117, [1, 0] : vector<16x128xf32> -> vector<128x16xf32>
    %119 = arith.index_cast %c3_i32 : i32 to index
    %c0_41 = arith.constant 0 : index
    %c0_42 = arith.constant 0 : index
    %120 = vector.load %arg4[%119, %c0_41, %c0_42] : memref<4x128x16xf32, #tpu.memory_space<vmem>>, vector<1x128x16xf32>
    %121 = vector.shape_cast %120 : vector<1x128x16xf32> to vector<128x16xf32>
    %122 = vector.shape_cast %118 : vector<128x16xf32> to vector<1x128x16xf32>
    tpu.vector_store %arg4[%119, %c0_41, %c0_42], %122 {strides = array<i32>} : memref<4x128x16xf32, #tpu.memory_space<vmem>>, vector<1x128x16xf32>,
    %c4_i32 = arith.constant 4 : i32
    return
  }
  func.func @transform_0(%arg0: i32) -> (i32, i32, i32) {
    %c0_i32 = arith.constant 0 : i32
    %c0_i32_0 = arith.constant 0 : i32
    %c0_i32_1 = arith.constant 0 : i32
    return %arg0, %c0_i32, %c0_i32_0 : i32, i32, i32
  }
  func.func @transform_1(%arg0: i32) -> (i32, i32) {
    %c0_i32 = arith.constant 0 : i32
    %c0_i32_0 = arith.constant 0 : i32
    %c0_i32_1 = arith.constant 0 : i32
    return %c0_i32, %c0_i32_0 : i32, i32
  }
  func.func @transform_2(%arg0: i32) -> (i32, i32) {
    %c0_i32 = arith.constant 0 : i32
    %c0_i32_0 = arith.constant 0 : i32
    %c0_i32_1 = arith.constant 0 : i32
    return %c0_i32, %c0_i32_0 : i32, i32
  }
  func.func @transform_3(%arg0: i32) -> (i32, i32, i32) {
    %c0_i32 = arith.constant 0 : i32
    %c0_i32_0 = arith.constant 0 : i32
    %c0_i32_1 = arith.constant 0 : i32
    return %arg0, %c0_i32, %c0_i32_0 : i32, i32, i32
  }
}

</mosaic_0001>

<bundles_post_ra>
// kernel: tpu_custom_call.1
= control target key start
LH: loop header
LB: loop body
LE: loop exit
PB: predicated region body
PF: predicated region fallthrough
CT: control target
= control target key end

     0   :  { %s1897_s12 = smov 0   ;;  %s2393_s0 = inlined_call_operand.vmem [shape: f32[8,128,32], index: 0, kind: input, shape index: {}]   ;;  %s2394_s1 = inlined_call_operand.vmem [shape: f32[16,32], index: 1, kind: input, shape index: {}]   ;;  %s2395_s2 = inlined_call_operand.vmem [shape: f32[16,2], index: 2, kind: input, shape index: {}]   ;;  %s2396_s3 = inlined_call_operand.vmem [shape: f32[8,128,16], index: 3, kind: output, shape index: {}]  }
   0x1 LB: > { %s1243_s13 = sadd.s32 4294967295, %s1872_s12   ;;  %p1247_p0 = scmp.ge.s32.totalorder %s1872_s12, 1  ;;  %s1872_s12 = sphi %s1897_s12, %s13_s12  }
   0x2   : > { %p139_p1 = scmp.lt.s32.totalorder %s1872_s12, 3 }
   0x4   : > { %p140_p2 = pnand %p1247_p0, %p139_p1 }
   0x5   : > { %s1248_s14 = sshll.u32 (!%p140_p2), %s1243_s13, 2  ;;  %vm199_vm0 = vcmask (!%p140_p2), 261120   ;;  %v1908_v0 = vld [vmem:[%s2394_s1] sm:$0xff] (!%p140_p2)  ;;  %v2041_v60 = vld [vmem:[%s2394_s1 + $0x8] sm:$0xff] (!%p140_p2)  ;;  %s1875_s27 = smov (!%p140_p2), 1   ;;  %vm421_vm2 = vcmask (!%p140_p2), 130048  }
   0x6   : > { %143 = sbr.rel (%p140_p2) target bundleno = 1350 (0x546), region = 32  ;;  %p166_p3 = scmp.lt.s32.totalorder (!%p140_p2), %s1248_s14, 7  ;;  %1530 = vmatprep.mubr.msk.f32.mxu0 (!%p140_p2), %vm199_vm0, %v1908_v0  ;;  %1565 = vmatprep.mubr.msk.f32.mxu1 (!%p140_p2), %vm199_vm0, %v1908_v0  ;;  %vm1926_vm1 = vmpackc.low (!%p140_p2), %vm199_vm0, %vm199_vm0 }
   0xd   : > { %s2400_s14 = smov (!%p166_p3, %s1248_s14), 7 }
   0xe   : > { %s1424_s17 = sshll.u32 %s2400_s14, 7 }
   0xf   : > { %s1922_s20 = scalar_lea.vmem %s2393_s0, %s1424_s17  ;;  %s2254_s30 = scalar_lea.vmem %s2396_s3, %s1424_s17 }
  0x10   : > { %v183_v2 = vld [vmem:[%s1922_s20] sm:$0xff]  ;;  %v184_v3 = vld [vmem:[%s1922_s20 + $0x8] sm:$0xff]  ;;  %v185_v7 = vld [vmem:[%s1922_s20 + $0x10] sm:$0xff] }
  0x11   : > { %v1272_v4 = vld [vmem:[%s1922_s20 + $0x80] sm:$0xff]  ;;  %v1638_v5 = vpack.c.bf16 %v184_v3, %v183_v2  ;;  %v1273_v6 = vld [vmem:[%s1922_s20 + $0x88] sm:$0xff]  ;;  %v186_v8 = vld [vmem:[%s1922_s20 + $0x18] sm:$0xff] }
  0x12   : > { %v1686_v9 = vpack.c.bf16 %v1273_v6, %v1272_v4  ;;  %v1644_v10 = vpack.c.bf16 %v186_v8, %v185_v7  ;;  %v1274_v11 = vld [vmem:[%s1922_s20 + $0x90] sm:$0xff]  ;;  %v1275_v12 = vld [vmem:[%s1922_s20 + $0x98] sm:$0xff]  ;;  %v187_v14 = vld [vmem:[%s1922_s20 + $0x20] sm:$0xff] }
  0x13   : > { %1640 = vmatprep.subr.msk.bf16.mxu0 %vm1926_vm1, %v1638_v5  ;;  %v1692_v13 = vpack.c.bf16 %v1275_v12, %v1274_v11  ;;  %v188_v15 = vld [vmem:[%s1922_s20 + $0x28] sm:$0xff]  ;;  %v1276_v16 = vld [vmem:[%s1922_s20 + $0xa0] sm:$0xff]  ;;  %v189_v20 = vld [vmem:[%s1922_s20 + $0x30] sm:$0xff] }
  0x14   : > { %1688 = vmatprep.subr.msk.bf16.mxu1 %vm1926_vm1, %v1686_v9  ;;  %1643 = vmatpush3.bf16.xpose.msk.msra.mxu0 %vm1926_vm1, %v1638_v5  ;;  %v1277_v17 = vld [vmem:[%s1922_s20 + $0xa8] sm:$0xff]  ;;  %v1650_v18 = vpack.c.bf16 %v188_v15, %v187_v14  ;;  %v190_v21 = vld [vmem:[%s1922_s20 + $0x38] sm:$0xff]  ;;  %v1278_v22 = vld [vmem:[%s1922_s20 + $0xb0] sm:$0xff] }
  0x15   : > { %1691 = vmatpush3.bf16.xpose.msk.msra.mxu1 %vm1926_vm1, %v1686_v9  ;;  %1646 = vmatprep.subr.msk.bf16.mxu0 %vm1926_vm1, %v1644_v10  ;;  %v1698_v19 = vpack.c.bf16 %v1277_v17, %v1276_v16  ;;  %v1279_v23 = vld [vmem:[%s1922_s20 + $0xb8] sm:$0xff]  ;;  %v1656_v24 = vpack.c.bf16 %v190_v21, %v189_v20  ;;  %v191_v26 = vld [vmem:[%s1922_s20 + $0x40] sm:$0xff]  ;;  %v192_v27 = vld [vmem:[%s1922_s20 + $0x48] sm:$0xff] }
  0x16   : > { %1694 = vmatprep.subr.msk.bf16.mxu1 %vm1926_vm1, %v1692_v13  ;;  %v1704_v25 = vpack.c.bf16 %v1279_v23, %v1278_v22  ;;  %v1280_v28 = vld [vmem:[%s1922_s20 + $0xc0] sm:$0xff]  ;;  %v1281_v29 = vld [vmem:[%s1922_s20 + $0xc8] sm:$0xff]  ;;  %v1662_v30 = vpack.c.bf16 %v192_v27, %v191_v26  ;;  %v193_v32 = vld [vmem:[%s1922_s20 + $0x50] sm:$0xff] }
  0x17   : > { %v1710_v31 = vpack.c.bf16 %v1281_v29, %v1280_v28  ;;  %v194_v33 = vld [vmem:[%s1922_s20 + $0x58] sm:$0xff]  ;;  %v1282_v34 = vld [vmem:[%s1922_s20 + $0xd0] sm:$0xff]  ;;  %v195_v38 = vld [vmem:[%s1922_s20 + $0x60] sm:$0xff] }
  0x18   : > { %v1283_v35 = vld [vmem:[%s1922_s20 + $0xd8] sm:$0xff]  ;;  %v1668_v36 = vpack.c.bf16 %v194_v33, %v193_v32  ;;  %v196_v39 = vld [vmem:[%s1922_s20 + $0x68] sm:$0xff]  ;;  %v1284_v40 = vld [vmem:[%s1922_s20 + $0xe0] sm:$0xff] }
  0x19   : > { %v1716_v37 = vpack.c.bf16 %v1283_v35, %v1282_v34  ;;  %v1285_v41 = vld [vmem:[%s1922_s20 + $0xe8] sm:$0xff]  ;;  %v1674_v42 = vpack.c.bf16 %v196_v39, %v195_v38  ;;  %v197_v44 = vld [vmem:[%s1922_s20 + $0x70] sm:$0xff]  ;;  %v198_v45 = vld [vmem:[%s1922_s20 + $0x78] sm:$0xff] }
  0x1a   : > { %v1722_v43 = vpack.c.bf16 %v1285_v41, %v1284_v40  ;;  %v1286_v46 = vld [vmem:[%s1922_s20 + $0xf0] sm:$0xff]  ;;  %v1287_v47 = vld [vmem:[%s1922_s20 + $0xf8] sm:$0xff]  ;;  %v1680_v48 = vpack.c.bf16 %v198_v45, %v197_v44  ;;  %v1322_v50 = vld [vmem:[%s1922_s20 + $0x100] sm:$0xff] }
  0x1b   : > { %v1728_v49 = vpack.c.bf16 %v1287_v47, %v1286_v46  ;;  %v1323_v51 = vld [vmem:[%s1922_s20 + $0x108] sm:$0xff]  ;;  %v1372_v52 = vld [vmem:[%s1922_s20 + $0x180] sm:$0xff]  ;;  %v1324_v56 = vld [vmem:[%s1922_s20 + $0x110] sm:$0xff] }
  0x1c   : > { %1649 = vmatpush3.bf16.xpose.msk.msra.mxu0 %vm1926_vm1, %v1644_v10  ;;  %v1373_v53 = vld [vmem:[%s1922_s20 + $0x188] sm:$0xff]  ;;  %v1734_v54 = vpack.c.bf16 %v1323_v51, %v1322_v50  ;;  %v1325_v57 = vld [vmem:[%s1922_s20 + $0x118] sm:$0xff]  ;;  %v1374_v58 = vld [vmem:[%s1922_s20 + $0x190] sm:$0xff] }
  0x1d   : > { %1697 = vmatpush3.bf16.xpose.msk.msra.mxu1 %vm1926_vm1, %v1692_v13  ;;  %1652 = vmatprep.subr.msk.bf16.mxu0 %vm1926_vm1, %v1650_v18  ;;  %v1782_v55 = vpack.c.bf16 %v1373_v53, %v1372_v52  ;;  %v1375_v59 = vld [vmem:[%s1922_s20 + $0x198] sm:$0xff]  ;;  %v1740_v61 = vpack.c.bf16 %v1325_v57, %v1324_v56  ;;  %v1326_v63 = vld [vmem:[%s1922_s20 + $0x120] sm:$0xff]  ;;  %v1327_v2 = vld [vmem:[%s1922_s20 + $0x128] sm:$0xff] }
  0x1e   : > { %1700 = vmatprep.subr.msk.bf16.mxu1 %vm1926_vm1, %v1698_v19  ;;  %v1788_v62 = vpack.c.bf16 %v1375_v59, %v1374_v58  ;;  %v1376_v3 = vld [vmem:[%s1922_s20 + $0x1a0] sm:$0xff]  ;;  %v1377_v4 = vld [vmem:[%s1922_s20 + $0x1a8] sm:$0xff]  ;;  %v1746_v5 = vpack.c.bf16 %v1327_v2, %v1326_v63  ;;  %v1328_v7 = vld [vmem:[%s1922_s20 + $0x130] sm:$0xff] }
  0x1f   : > { %v1794_v6 = vpack.c.bf16 %v1377_v4, %v1376_v3  ;;  %v1378_v8 = vld [vmem:[%s1922_s20 + $0x1b0] sm:$0xff]  ;;  %v1379_v9 = vld [vmem:[%s1922_s20 + $0x1b8] sm:$0xff]  ;;  %v1330_v12 = vld [vmem:[%s1922_s20 + $0x140] sm:$0xff] }
  0x20   : > { %v1800_v11 = vpack.c.bf16 %v1379_v9, %v1378_v8  ;;  %v1331_v13 = vld [vmem:[%s1922_s20 + $0x148] sm:$0xff]  ;;  %v1380_v14 = vld [vmem:[%s1922_s20 + $0x1c0] sm:$0xff]  ;;  %v1382_v20 = vld [vmem:[%s1922_s20 + $0x1d0] sm:$0xff] }
  0x21   : > { %v1381_v15 = vld [vmem:[%s1922_s20 + $0x1c8] sm:$0xff]  ;;  %v1758_v16 = vpack.c.bf16 %v1331_v13, %v1330_v12  ;;  %v1383_v21 = vld [vmem:[%s1922_s20 + $0x1d8] sm:$0xff]  ;;  %v1384_v26 = vld [vmem:[%s1922_s20 + $0x1e0] sm:$0xff] }
  0x22   : > { %v1806_v17 = vpack.c.bf16 %v1381_v15, %v1380_v14  ;;  %v1812_v23 = vpack.c.bf16 %v1383_v21, %v1382_v20  ;;  %v1385_v27 = vld [vmem:[%s1922_s20 + $0x1e8] sm:$0xff]  ;;  %v1386_v32 = vld [vmem:[%s1922_s20 + $0x1f0] sm:$0xff]  ;;  %v1387_v33 = vld [vmem:[%s1922_s20 + $0x1f8] sm:$0xff] }
  0x23   : > { %v1818_v29 = vpack.c.bf16 %v1385_v27, %v1384_v26  ;;  %v1824_v35 = vpack.c.bf16 %v1387_v33, %v1386_v32  ;;  %v1876_v26 = vmov 1  }
  0x24   : > { %1655 = vmatpush3.bf16.xpose.msk.msra.mxu0 %vm1926_vm1, %v1650_v18  ;;  %v1332_v18 = vld [vmem:[%s1922_s20 + $0x150] sm:$0xff] }
  0x25   : > { %1703 = vmatpush3.bf16.xpose.msk.msra.mxu1 %vm1926_vm1, %v1698_v19  ;;  %1658 = vmatprep.subr.msk.bf16.mxu0 %vm1926_vm1, %v1656_v24  ;;  %v1333_v19 = vld [vmem:[%s1922_s20 + $0x158] sm:$0xff] }
  0x26   : > { %1706 = vmatprep.subr.msk.bf16.mxu1 %vm1926_vm1, %v1704_v25  ;;  %v1764_v22 = vpack.c.bf16 %v1333_v19, %v1332_v18  ;;  %v2190_v19 = vld [vmem:[%s2395_s2] sm:$0xff] }
  0x2c   : > { %1661 = vmatpush3.bf16.xpose.msk.msra.mxu0 %vm1926_vm1, %v1656_v24  ;;  %v1334_v24 = vld [vmem:[%s1922_s20 + $0x160] sm:$0xff] }
  0x2d   : > { %1709 = vmatpush3.bf16.xpose.msk.msra.mxu1 %vm1926_vm1, %v1704_v25  ;;  %1664 = vmatprep.subr.msk.bf16.mxu0 %vm1926_vm1, %v1662_v30  ;;  %v1335_v25 = vld [vmem:[%s1922_s20 + $0x168] sm:$0xff] }
  0x2e   : > { %1712 = vmatprep.subr.msk.bf16.mxu1 %vm1926_vm1, %v1710_v31  ;;  %v1770_v28 = vpack.c.bf16 %v1335_v25, %v1334_v24 }
  0x34   : > { %1667 = vmatpush3.bf16.xpose.msk.msra.mxu0 %vm1926_vm1, %v1662_v30  ;;  %v1336_v30 = vld [vmem:[%s1922_s20 + $0x170] sm:$0xff] }
  0x35   : > { %1715 = vmatpush3.bf16.xpose.msk.msra.mxu1 %vm1926_vm1, %v1710_v31  ;;  %1670 = vmatprep.subr.msk.bf16.mxu0 %vm1926_vm1, %v1668_v36  ;;  %v1337_v31 = vld [vmem:[%s1922_s20 + $0x178] sm:$0xff] }
  0x36   : > { %1718 = vmatprep.subr.msk.bf16.mxu1 %vm1926_vm1, %v1716_v37  ;;  %v1776_v34 = vpack.c.bf16 %v1337_v31, %v1336_v30 }
  0x3c   : > { %1673 = vmatpush3.bf16.xpose.msk.msra.mxu0 %vm1926_vm1, %v1668_v36 }
  0x3d   : > { %1721 = vmatpush3.bf16.xpose.msk.msra.mxu1 %vm1926_vm1, %v1716_v37  ;;  %1676 = vmatprep.subr.msk.bf16.mxu0 %vm1926_vm1, %v1674_v42 }
  0x3e   : > { %1724 = vmatprep.subr.msk.bf16.mxu1 %vm1926_vm1, %v1722_v43 }
  0x44   : > { %1679 = vmatpush3.bf16.xpose.msk.msra.mxu0 %vm1926_vm1, %v1674_v42 }
  0x45   : > { %1727 = vmatpush3.bf16.xpose.msk.msra.mxu1 %vm1926_vm1, %v1722_v43  ;;  %1682 = vmatprep.subr.msk.bf16.mxu0 %vm1926_vm1, %v1680_v48  ;;  %v1874_v43 = vmov 0  }
  0x46   : > { %1730 = vmatprep.subr.msk.bf16.mxu1 %vm1926_vm1, %v1728_v49  ;;  %1842 = vset.pattern.permute.xlu1 %v1874_v43 }
  0x47   : > { %1843 = vset.pattern.permute.xlu0 %v1874_v43 }
  0x4c   : > { %1685 = vmatpush3.bf16.xpose.msk.msra.mxu0 %vm1926_vm1, %v1680_v48 }
  0x4d   : > { %1733 = vmatpush3.bf16.xpose.msk.msra.mxu1 %vm1926_vm1, %v1728_v49  ;;  %1736 = vmatprep.subr.msk.bf16.mxu0 %vm1926_vm1, %v1734_v54 }
  0x4e   : > { %1784 = vmatprep.subr.msk.bf16.mxu1 %vm1926_vm1, %v1782_v55 }
  0x53   : > { %1531 = vmatmul.mubr.msk.f32.vlgmr.msra.gmra.mrb[0].mxu0 %vm199_vm0, %v2041_v60 }
  0x54   : > { %1566 = vmatmul.mubr.msk.f32.vlgmr.msra.gmra.mrb[0].mxu1 %vm199_vm0, %v2041_v60  ;;  %1739 = vmatpush3.bf16.xpose.msk.msra.mxu0 %vm1926_vm1, %v1734_v54 }
  0x55   : > { %1787 = vmatpush3.bf16.xpose.msk.msra.mxu1 %vm1926_vm1, %v1782_v55  ;;  %1742 = vmatprep.subr.msk.bf16.mxu0 %vm1926_vm1, %v1740_v61 }
  0x56   : > { %1790 = vmatprep.subr.msk.bf16.mxu1 %vm1926_vm1, %v1788_v62  ;;  %1635 = vmatprep.mubr.msk.f32.mxu1 %vm199_vm0, %v1908_v0 }
  0x57   : > { %1600 = vmatprep.mubr.msk.f32.mxu0 %vm199_vm0, %v1908_v0  ;;  %v1329_v0 = vld [vmem:[%s1922_s20 + $0x138] sm:$0xff] }
  0x58   : > { %v1752_v10 = vpack.c.bf16 %v1329_v0, %v1328_v7 }
  0x5c   : > { %1745 = vmatpush3.bf16.xpose.msk.msra.mxu0 %vm1926_vm1, %v1740_v61 }
  0x5d   : > { %1793 = vmatpush3.bf16.xpose.msk.msra.mxu1 %vm1926_vm1, %v1788_v62  ;;  %1748 = vmatprep.subr.msk.bf16.mxu0 %vm1926_vm1, %v1746_v5 }
  0x5e   : > { %1796 = vmatprep.subr.msk.bf16.mxu1 %vm1926_vm1, %v1794_v6 }
  0x64   : > { %1751 = vmatpush3.bf16.xpose.msk.msra.mxu0 %vm1926_vm1, %v1746_v5 }
  0x65   : > { %1799 = vmatpush3.bf16.xpose.msk.msra.mxu1 %vm1926_vm1, %v1794_v6  ;;  %1754 = vmatprep.subr.msk.bf16.mxu0 %vm1926_vm1, %v1752_v10 }
  0x66   : > { %1802 = vmatprep.subr.msk.bf16.mxu1 %vm1926_vm1, %v1800_v11 }
  0x6c   : > { %1757 = vmatpush3.bf16.xpose.msk.msra.mxu0 %vm1926_vm1, %v1752_v10  ;;  %v2184_v10 = vld [vmem:[%s2395_s2 + $0x8] sm:$0xff] }
  0x6d   : > { %1805 = vmatpush3.bf16.xpose.msk.msra.mxu1 %vm1926_vm1, %v1800_v11  ;;  %1760 = vmatprep.subr.msk.bf16.mxu0 %vm1926_vm1, %v1758_v16 }
  0x6e   : > { %1808 = vmatprep.subr.msk.bf16.mxu1 %vm1926_vm1, %v1806_v17 }
  0x74   : > { %1763 = vmatpush3.bf16.xpose.msk.msra.mxu0 %vm1926_vm1, %v1758_v16 }
  0x75   : > { %1811 = vmatpush3.bf16.xpose.msk.msra.mxu1 %vm1926_vm1, %v1806_v17  ;;  %1766 = vmatprep.subr.msk.bf16.mxu0 %vm1926_vm1, %v1764_v22 }
  0x76   : > { %1814 = vmatprep.subr.msk.bf16.mxu1 %vm1926_vm1, %v1812_v23 }
  0x7c   : > { %1769 = vmatpush3.bf16.xpose.msk.msra.mxu0 %vm1926_vm1, %v1764_v22 }
  0x7d   : > { %1817 = vmatpush3.bf16.xpose.msk.msra.mxu1 %vm1926_vm1, %v1812_v23  ;;  %1772 = vmatprep.subr.msk.bf16.mxu0 %vm1926_vm1, %v1770_v28 }
  0x7e   : > { %1820 = vmatprep.subr.msk.bf16.mxu1 %vm1926_vm1, %v1818_v29 }
  0x84   : > { %1775 = vmatpush3.bf16.xpose.msk.msra.mxu0 %vm1926_vm1, %v1770_v28 }
  0x85   : > { %1823 = vmatpush3.bf16.xpose.msk.msra.mxu1 %vm1926_vm1, %v1818_v29  ;;  %1778 = vmatprep.subr.msk.bf16.mxu0 %vm1926_vm1, %v1776_v34 }
  0x86   : > { %1826 = vmatprep.subr.msk.bf16.mxu1 %vm1926_vm1, %v1824_v35 }
  0x8c   : > { %1781 = vmatpush3.bf16.xpose.msk.msra.mxu0 %vm1926_vm1, %v1776_v34 }
  0x8d   : > { %1829 = vmatpush3.bf16.xpose.msk.msra.mxu1 %vm1926_vm1, %v1824_v35 }
  0x93   : > { %1601 = vmatmul.mubr.msk.f32.vlgmr.msra.gmra.mrb[2].mxu0 %vm199_vm0, %v2041_v60 }
  0x94   : > { %1636 = vmatmul.mubr.msk.f32.vlgmr.msra.gmra.mrb[2].mxu1 %vm199_vm0, %v2041_v60 }
 0x126   : > { %v2139_v36 = vpop.f32.mrb[0].mxu0 }
 0x127   : > { %331 = vadd.xlane.f32.xlu0 %v2139_v36  ;;  %v2142_v37 = vpop.f32.mrb[1].mxu0  ;;  %v2144_v38 = vpop.f32.mrb[0].mxu1  ;;  %v334_v39 = vmul.f32 %v2139_v36, %v2139_v36 }
 0x128   : > { %v2148_v40 = vpop.f32.mrb[1].mxu1  ;;  %v333_v1 = vmul.f32 %v2142_v37, %v2142_v37  ;;  %v583_v41 = vmul.f32 %v2144_v38, %v2144_v38 }
 0x129   : > { %337 = vadd.xlane.f32.xlu1 %v334_v39  ;;  %v582_v42 = vmul.f32 %v2148_v40, %v2148_v40 }
 0x12b   : > { %580 = vadd.xlane.f32.xlu0 %v2144_v38 }
 0x12d   : > { %335 = vadd.xlane.f32.xlu1 %v333_v1 }
 0x12f   : > { %329 = vadd.xlane.f32.xlu0 %v2142_v37 }
 0x133   : > { %578 = vadd.xlane.f32.xlu0 %v2148_v40 }
 0x137   : > { %586 = vadd.xlane.f32.xlu0 %v583_v41 }
 0x13b   : > { %584 = vadd.xlane.f32.xlu0 %v582_v42 }
 0x166   : > { %v2161_v44 = vpop.f32.mrb[2].mxu0 }
 0x167   : > { %v2163_v45 = vpop.f32.mrb[2].mxu1  ;;  %v2165_v46 = vpop.f32.mrb[3].mxu0  ;;  %829 = vadd.xlane.f32.xlu1 %v2161_v44  ;;  %v832_v48 = vmul.f32 %v2161_v44, %v2161_v44 }
 0x168   : > { %1078 = vadd.xlane.f32.xlu0 %v2163_v45  ;;  %v2169_v47 = vpop.f32.mrb[3].mxu1  ;;  %v1081_v49 = vmul.f32 %v2163_v45, %v2163_v45  ;;  %v831_v50 = vmul.f32 %v2165_v46, %v2165_v46 }
 0x169   : > { %v1080_v51 = vmul.f32 %v2169_v47, %v2169_v47 }
 0x16c   : > { %827 = vadd.xlane.f32.xlu0 %v2165_v46 }
 0x170   : > { %1076 = vadd.xlane.f32.xlu0 %v2169_v47 }
 0x174   : > { %835 = vadd.xlane.f32.xlu0 %v832_v48 }
 0x178   : > { %1084 = vadd.xlane.f32.xlu0 %v1081_v49 }
 0x17c   : > { %833 = vadd.xlane.f32.xlu0 %v831_v50 }
 0x180   : > { %1082 = vadd.xlane.f32.xlu0 %v1080_v51 }
 0x1b4   : > { %v332_v52 = vpop.xlane.xlu0 %331 }
 0x1b5   : > { %v340_v53 = vmul.f32 0.0078125, %v332_v52 }
 0x1b6   : > { %v338_v54 = vpop.xlane.xlu1 %337 }
 0x1b7   : > { %v344_v55 = vmul.f32 %v340_v53, %v340_v53  ;;  %v342_v56 = vmul.f32 0.0078125, %v338_v54 }
 0x1b8   : > { %v581_v57 = vpop.xlane.xlu0 %580 }
 0x1b9   : > { %v346_v58 = vsub.f32 %v342_v56, %v344_v55  ;;  %v589_v4 = vmul.f32 0.0078125, %v581_v57 }
 0x1ba   : > { %v336_v60 = vpop.xlane.xlu1 %335 }
 0x1bb   : > { %v348_v59 = vadd.f32 1e-05, %v346_v58  ;;  %v341_v63 = vmul.f32 0.0078125, %v336_v60  ;;  %v593_v0 = vmul.f32 %v589_v4, %v589_v4 }
 0x1bc   : > { %v330_v61 = vpop.xlane.xlu0 %329 }
 0x1bd   : > { %1850 = vrsqrt.f32 %v348_v59  ;;  %v339_v62 = vmul.f32 0.0078125, %v330_v61 }
 0x1bf   : > { %v343_v2 = vmul.f32 %v339_v62, %v339_v62 }
 0x1c0   : > { %v579_v3 = vpop.xlane.xlu0 %578 }
 0x1c1   : > { %v345_v5 = vsub.f32 %v341_v63, %v343_v2  ;;  %v588_v8 = vmul.f32 0.0078125, %v579_v3 }
 0x1c3   : > { %v347_v6 = vadd.f32 1e-05, %v345_v5  ;;  %v592_v15 = vmul.f32 %v588_v8, %v588_v8 }
 0x1c4   : > { %v587_v7 = vpop.xlane.xlu0 %586 }
 0x1c5   : > { %1852 = vrsqrt.f32 %v347_v6  ;;  %v591_v9 = vmul.f32 0.0078125, %v587_v7 }
 0x1c7   : > { %v1851_v11 = vpop.eup %1850  ;;  %v595_v12 = vsub.f32 %v591_v9, %v593_v0 }
 0x1c8   : > { %v585_v13 = vpop.xlane.xlu0 %584  ;;  %v352_v14 = vmul.f32 %v1851_v11, %v2184_v10 }
 0x1c9   : > { %v597_v16 = vadd.f32 1e-05, %v595_v12  ;;  %v590_v17 = vmul.f32 0.0078125, %v585_v13 }
 0x1ca   : > { %372 = vperm.xlu1 %1842, %v352_v14   ;;  %v354_v23 = vmul.f32 %v352_v14, %v340_v53 }
 0x1cb   : > { %1854 = vrsqrt.f32 %v597_v16  ;;  %v594_v18 = vsub.f32 %v590_v17, %v592_v15 }
 0x1cd   : > { %v596_v20 = vadd.f32 1e-05, %v594_v18 }
 0x1cf   : > { %v1853_v21 = vpop.eup %1852  ;;  %1856 = vrsqrt.f32 %v596_v20 }
 0x1d0   : > { %v351_v22 = vmul.f32 %v1853_v21, %v2190_v19 }
 0x1d2   : > { %367 = vperm.xlu1 %1842, %v351_v22   ;;  %v353_v30 = vmul.f32 %v351_v22, %v339_v62 }
 0x1d5   : > { %v1855_v24 = vpop.eup %1854 }
 0x1d6   : > { %359 = vrot.lane.b32.xlu1 %v354_v23, %s1875_s27  ;;  %v601_v25 = vmul.f32 %v1855_v24, %v2184_v10 }
 0x1d7   : > { %1844 = vset.pattern.permute.xlu1 %v1876_v26 }
 0x1d8   : > { %621 = vperm.xlu0 %1843, %v601_v25   ;;  %v603_v29 = vmul.f32 %v601_v25, %v589_v4 }
 0x1d9   : > { %v1857_v27 = vpop.eup %1856 }
 0x1da   : > { %v600_v28 = vmul.f32 %v1857_v27, %v2190_v19 }
 0x1dc   : > { %616 = vperm.xlu0 %1843, %v600_v28   ;;  %v602_v31 = vmul.f32 %v600_v28, %v588_v8 }
 0x1e0   : > { %608 = vrot.lane.b32.xlu0 %v603_v29, %s1875_s27 }
 0x1e1   : > { %1845 = vset.pattern.permute.xlu0 %v1876_v26 }
 0x1e4   : > { %357 = vrot.lane.b32.xlu0 %v353_v30, %s1875_s27 }
 0x1e8   : > { %606 = vrot.lane.b32.xlu0 %v602_v31, %s1875_s27 }
 0x1f4   : > { %v830_v62 = vpop.xlane.xlu1 %829 }
 0x1f5   : > { %v1079_v32 = vpop.xlane.xlu0 %1078  ;;  %v838_v63 = vmul.f32 0.0078125, %v830_v62 }
 0x1f6   : > { %v1087_v35 = vmul.f32 0.0078125, %v1079_v32 }
 0x1f7   : > { %v842_v3 = vmul.f32 %v838_v63, %v838_v63 }
 0x1f8   : > { %v1091_v1 = vmul.f32 %v1087_v35, %v1087_v35 }
 0x1f9   : > { %v828_v33 = vpop.xlane.xlu0 %827 }
 0x1fa   : > { %v837_v41 = vmul.f32 0.0078125, %v828_v33 }
 0x1fc   : > { %v841_v49 = vmul.f32 %v837_v41, %v837_v41 }
 0x1fd   : > { %v1077_v34 = vpop.xlane.xlu0 %1076 }
 0x1fe   : > { %v2204_v6 = vmul.f32 0.0078125, %v1077_v34 }
 0x200   : > { %v1090_v9 = vmul.f32 %v2204_v6, %v2204_v6 }
 0x201   : > { %v836_v39 = vpop.xlane.xlu0 %835 }
 0x202   : > { %v840_v2 = vmul.f32 0.0078125, %v836_v39 }
 0x204   : > { %v844_v4 = vsub.f32 %v840_v2, %v842_v3 }
 0x205   : > { %v1085_v42 = vpop.xlane.xlu0 %1084 }
 0x206   : > { %v1089_v48 = vmul.f32 0.0078125, %v1085_v42  ;;  %v846_v5 = vadd.f32 1e-05, %v844_v4 }
 0x208   : > { %v1093_v50 = vsub.f32 %v1089_v48, %v1091_v1 }
 0x209   : > { %v834_v51 = vpop.xlane.xlu0 %833 }
 0x20a   : > { %v1095_v52 = vadd.f32 1e-05, %v1093_v50  ;;  %v839_v53 = vmul.f32 0.0078125, %v834_v51 }
 0x20c   : > { %1858 = vrsqrt.f32 %v1095_v52  ;;  %v843_v54 = vsub.f32 %v839_v53, %v841_v49 }
 0x20d   : > { %v1083_v0 = vpop.xlane.xlu0 %1082 }
 0x20e   : > { %v845_v55 = vadd.f32 1e-05, %v843_v54  ;;  %v1088_v11 = vmul.f32 0.0078125, %v1083_v0 }
 0x210   : > { %1860 = vrsqrt.f32 %v845_v55  ;;  %v1092_v12 = vsub.f32 %v1088_v11, %v1090_v9 }
 0x211   : > { %1862 = vrsqrt.f32 %v846_v5 }
 0x212   : > { %v1094_v16 = vadd.f32 1e-05, %v1092_v12 }
 0x214   : > { %1864 = vrsqrt.f32 %v1094_v16 }
 0x216   : > { %v1859_v56 = vpop.eup %1858 }
 0x217   : > { %v1099_v57 = vmul.f32 %v1859_v56, %v2184_v10 }
 0x219   : > { %v1101_v58 = vmul.f32 %v1099_v57, %v1087_v35 }
 0x21a   : > { %v1861_v59 = vpop.eup %1860 }
 0x21b   : > { %v849_v60 = vmul.f32 %v1861_v59, %v2190_v19  ;;  %v1863_v15 = vpop.eup %1862 }
 0x21c   : > { %v850_v18 = vmul.f32 %v1863_v15, %v2184_v10 }
 0x21d   : > { %v851_v61 = vmul.f32 %v849_v60, %v837_v41 }
 0x21e   : > { %v1865_v27 = vpop.eup %1864 }
 0x21f   : > { %855 = vrot.lane.b32.xlu1 %v851_v61, %s1875_s27  ;;  %v1098_v29 = vmul.f32 %v1865_v27, %v2190_v19 }
 0x221   : > { %v1100_v55 = vmul.f32 %v1098_v29, %v2204_v6 }
 0x249   : > { %v373_v7 = vpop.permute.xlu1 %372 }
 0x24a   : > { %v2207_v8 = vmul.f32 %v2139_v36, %v373_v7  ;;  %v852_v36 = vmul.f32 %v850_v18, %v838_v63 }
 0x251   : > { %v368_v13 = vpop.permute.xlu1 %367 }
 0x252   : > { %v375_v14 = vmul.f32 %v368_v13, %v2142_v37 }
 0x255   : > { %v360_v17 = vpop.permute.xlu1 %359 }
 0x256   : > { %v364_v20 = vsub.f32 %v2184_v10, %v360_v17 }
 0x257   : > { %v622_v21 = vpop.permute.xlu0 %621 }
 0x258   : > { %v625_v22 = vmul.f32 %v2144_v38, %v622_v21  ;;  %384 = vperm.xlu1 %1844, %v364_v20  }
 0x25b   : > { %v617_v23 = vpop.permute.xlu0 %616 }
 0x25c   : > { %v624_v24 = vmul.f32 %v617_v23, %v2148_v40  ;;  %857 = vrot.lane.b32.xlu1 %v852_v36, %s1875_s27 }
 0x25d   : > { %1846 = vset.pattern.permute.xlu1 %v1874_v43 }
 0x25f   : > { %v609_v37 = vpop.permute.xlu0 %608 }
 0x260   : > { %v613_v25 = vsub.f32 %v2184_v10, %v609_v37  ;;  %1106 = vrot.lane.b32.xlu1 %v1101_v58, %s1875_s27 }
 0x262   : > { %633 = vperm.xlu0 %1845, %v613_v25  }
 0x263   : > { %v358_v28 = vpop.permute.xlu0 %357 }
 0x264   : > { %v363_v38 = vsub.f32 %v2190_v19, %v358_v28  ;;  %865 = vperm.xlu1 %1846, %v849_v60  }
 0x266   : > { %379 = vperm.xlu0 %1845, %v363_v38  }
 0x267   : > { %v607_v30 = vpop.permute.xlu0 %606 }
 0x268   : > { %v612_v40 = vsub.f32 %v2190_v19, %v607_v30  ;;  %1114 = vperm.xlu1 %1846, %v1098_v29  }
 0x26a   : > { %628 = vperm.xlu0 %1845, %v612_v40  }
 0x26c   : > { %870 = vperm.xlu1 %1846, %v850_v18  }
 0x270   : > { %1847 = vset.pattern.permute.xlu1 %v1876_v26 }
 0x291   : > { %v856_v31 = vpop.permute.xlu1 %855 }
 0x292   : > { %v861_v32 = vsub.f32 %v2190_v19, %v856_v31 }
 0x294   : > { %877 = vperm.xlu1 %1847, %v861_v32  }
 0x298   : > { %1848 = vset.pattern.permute.xlu1 %v1874_v43 }
 0x299   : > { %1119 = vperm.xlu1 %1848, %v1099_v57  }
 0x29d   : > { %1849 = vset.pattern.permute.xlu1 %v1876_v26 }
 0x2d7   : > { %v385_v33 = vpop.permute.xlu1 %384 }
 0x2d8   : > { %v388_v13 = vadd.f32 %v385_v33, %v2207_v8 }
 0x2db   : > { %v858_v34 = vpop.permute.xlu1 %857 }
 0x2dc   : > { %v862_v11 = vsub.f32 %v2184_v10, %v858_v34 }
 0x2df   : > { %v1107_v35 = vpop.permute.xlu1 %1106 }
 0x2e0   : > { %v1111_v12 = vsub.f32 %v2184_v10, %v1107_v35 }
 0x2e1   : > { %v634_v39 = vpop.permute.xlu0 %633 }
 0x2e2   : > { %v637_v52 = vadd.f32 %v634_v39, %v625_v22 }
 0x2e3   : > { %v866_v1 = vpop.permute.xlu1 %865 }
 0x2e5   : > { %v380_v41 = vpop.permute.xlu0 %379 }
 0x2e6   : > { %v387_v42 = vadd.f32 %v380_v41, %v375_v14  ;;  %v873_v14 = vmul.f32 %v866_v1, %v2165_v46 }
 0x2e7   : > { %v1115_v48 = vpop.permute.xlu1 %1114 }
 0x2e8   : > { %v1122_v49 = vmul.f32 %v1115_v48, %v2169_v47 }
 0x2e9   : > { %v629_v50 = vpop.permute.xlu0 %628 }
 0x2ea   : > { %v636_v51 = vadd.f32 %v629_v50, %v624_v24 }
 0x2eb   : > { %v871_v53 = vpop.permute.xlu1 %870 }
 0x2ec   : > { %638 = vxpose.xlu0.b32.start [1/2] (short) %v636_v51, 128  ;;  %v874_v17 = vmul.f32 %v2161_v44, %v871_v53 }
 0x2f0   : > { %639 = vxpose.xlu0.b32.end [2/2] (short) %v637_v52, 128 }
 0x313   : > { %v878_v43 = vpop.permute.xlu1 %877 }
 0x314   : > { %v885_v15 = vadd.f32 %v878_v43, %v873_v14 }
 0x318   : > { %v1120_v54 = vpop.permute.xlu1 %1119 }
 0x319   : > { %v1123_v26 = vmul.f32 %v2163_v45, %v1120_v54 }
 0x351   : > { %1104 = vrot.lane.b32.xlu0 %v1100_v55, %s1875_s27 }
 0x36c   : > { %v654_v56 = vpop.trf.xlu0 }
 0x36d   : > { %1306 = vst.msk [vmem:[%s2254_s30 + $0x80] sm:$0xff] %vm421_vm2, %v654_v56 }
 0x370   : > { %v655_v57 = vpop.trf.xlu0 }
 0x371   : > { %1307 = vst.msk [vmem:[%s2254_s30 + $0x88] sm:$0xff] %vm421_vm2, %v655_v57 }
 0x374   : > { %v656_v58 = vpop.trf.xlu0 }
 0x375   : > { %1308 = vst.msk [vmem:[%s2254_s30 + $0x90] sm:$0xff] %vm421_vm2, %v656_v58 }
 0x378   : > { %v657_v59 = vpop.trf.xlu0 }
 0x379   : > { %1309 = vst.msk [vmem:[%s2254_s30 + $0x98] sm:$0xff] %vm421_vm2, %v657_v59 }
 0x37c   : > { %v658_v60 = vpop.trf.xlu0 }
 0x37d   : > { %1310 = vst.msk [vmem:[%s2254_s30 + $0xa0] sm:$0xff] %vm421_vm2, %v658_v60 }
 0x380   : > { %v659_v47 = vpop.trf.xlu0 }
 0x381   : > { %1311 = vst.msk [vmem:[%s2254_s30 + $0xa8] sm:$0xff] %vm421_vm2, %v659_v47 }
 0x384   : > { %v660_v61 = vpop.trf.xlu0 }
 0x385   : > { %1312 = vst.msk [vmem:[%s2254_s30 + $0xb0] sm:$0xff] %vm421_vm2, %v660_v61 }
 0x388   : > { %v661_v62 = vpop.trf.xlu0 }
 0x389   : > { %1313 = vst.msk [vmem:[%s2254_s30 + $0xb8] sm:$0xff] %vm421_vm2, %v661_v62 }
 0x38c   : > { %v662_v63 = vpop.trf.xlu0 }
 0x38d   : > { %1314 = vst.msk [vmem:[%s2254_s30 + $0xc0] sm:$0xff] %vm421_vm2, %v662_v63 }
 0x390   : > { %v663_v2 = vpop.trf.xlu0 }
 0x391   : > { %1315 = vst.msk [vmem:[%s2254_s30 + $0xc8] sm:$0xff] %vm421_vm2, %v663_v2 }
 0x394   : > { %v2231_v3 = vpop.trf.xlu0 }
 0x395   : > { %1316 = vst.msk [vmem:[%s2254_s30 + $0xd0] sm:$0xff] %vm421_vm2, %v2231_v3 }
 0x398   : > { %v2233_v4 = vpop.trf.xlu0 }
 0x399   : > { %1317 = vst.msk [vmem:[%s2254_s30 + $0xd8] sm:$0xff] %vm421_vm2, %v2233_v4 }
 0x39c   : > { %v2235_v5 = vpop.trf.xlu0 }
 0x39d   : > { %1318 = vst.msk [vmem:[%s2254_s30 + $0xe0] sm:$0xff] %vm421_vm2, %v2235_v5 }
 0x3a0   : > { %v2237_v45 = vpop.trf.xlu0 }
 0x3a1   : > { %1319 = vst.msk [vmem:[%s2254_s30 + $0xe8] sm:$0xff] %vm421_vm2, %v2237_v45 }
 0x3a4   : > { %v2239_v6 = vpop.trf.xlu0 }
 0x3a5   : > { %1320 = vst.msk [vmem:[%s2254_s30 + $0xf0] sm:$0xff] %vm421_vm2, %v2239_v6 }
 0x3a8   : > { %v2241_v7 = vpop.trf.xlu0 }
 0x3a9   : > { %1321 = vst.msk [vmem:[%s2254_s30 + $0xf8] sm:$0xff] %vm421_vm2, %v2241_v7 }
 0x3c3   : > { %v1105_v0 = vpop.permute.xlu0 %1104 }
 0x3c4   : > { %v1110_v9 = vsub.f32 %v2190_v19, %v1105_v0 }
 0x3c6   : > { %1126 = vperm.xlu1 %1849, %v1110_v9  }
 0x3ca   : > { %882 = vperm.xlu1 %1849, %v862_v11  }
 0x3ce   : > { %1131 = vperm.xlu1 %1849, %v1111_v12  }
 0x3f7   : > { %389 = vxpose.xlu1.b32.start [1/2] (short) %v387_v42, 128 }
 0x3fb   : > { %390 = vxpose.xlu1.b32.end [2/2] (short) %v388_v13, 128 }
 0x434   : > { %887 = vxpose.xlu1.b32.start [1/2] (short) %v885_v15, 128 }
 0x445   : > { %v1127_v16 = vpop.permute.xlu1 %1126 }
 0x446   : > { %v1134_v8 = vadd.f32 %v1127_v16, %v1122_v49 }
 0x449   : > { %v883_v19 = vpop.permute.xlu1 %882 }
 0x44a   : > { %v886_v18 = vadd.f32 %v883_v19, %v874_v17 }
 0x44c   : > { %888 = vxpose.xlu1.b32.end [2/2] (short) %v886_v18, 128 }
 0x44d   : > { %v1132_v20 = vpop.permute.xlu1 %1131 }
 0x44e   : > { %v1135_v22 = vadd.f32 %v1132_v20, %v1123_v26 }
 0x477   : > { %v405_v44 = vpop.trf.xlu1 }
 0x478   : > { %422 = vst.msk [vmem:[%s2254_s30] sm:$0xff] %vm421_vm2, %v405_v44 }
 0x47b   : > { %v406_v46 = vpop.trf.xlu1 }
 0x47c   : > { %423 = vst.msk [vmem:[%s2254_s30 + $0x8] sm:$0xff] %vm421_vm2, %v406_v46 }
 0x47f   : > { %v407_v10 = vpop.trf.xlu1 }
 0x480   : > { %424 = vst.msk [vmem:[%s2254_s30 + $0x10] sm:$0xff] %vm421_vm2, %v407_v10 }
 0x483   : > { %v408_v21 = vpop.trf.xlu1 }
 0x484   : > { %425 = vst.msk [vmem:[%s2254_s30 + $0x18] sm:$0xff] %vm421_vm2, %v408_v21 }
 0x485   : > { %1136 = vxpose.xlu1.b32.start [1/2] (short) %v1134_v8, 128 }
 0x487   : > { %v409_v36 = vpop.trf.xlu1 }
 0x488   : > { %426 = vst.msk [vmem:[%s2254_s30 + $0x20] sm:$0xff] %vm421_vm2, %v409_v36 }
 0x489   : > { %1137 = vxpose.xlu1.b32.end [2/2] (short) %v1135_v22, 128 }
 0x48b   : > { %v410_v23 = vpop.trf.xlu1 }
 0x48c   : > { %427 = vst.msk [vmem:[%s2254_s30 + $0x28] sm:$0xff] %vm421_vm2, %v410_v23 }
 0x48f   : > { %v411_v24 = vpop.trf.xlu1 }
 0x490   : > { %428 = vst.msk [vmem:[%s2254_s30 + $0x30] sm:$0xff] %vm421_vm2, %v411_v24 }
 0x493   : > { %v412_v37 = vpop.trf.xlu1 }
 0x494   : > { %429 = vst.msk [vmem:[%s2254_s30 + $0x38] sm:$0xff] %vm421_vm2, %v412_v37 }
 0x497   : > { %v413_v25 = vpop.trf.xlu1 }
 0x498   : > { %430 = vst.msk [vmem:[%s2254_s30 + $0x40] sm:$0xff] %vm421_vm2, %v413_v25 }
 0x49b   : > { %v414_v27 = vpop.trf.xlu1 }
 0x49c   : > { %431 = vst.msk [vmem:[%s2254_s30 + $0x48] sm:$0xff] %vm421_vm2, %v414_v27 }
 0x49f   : > { %v415_v28 = vpop.trf.xlu1 }
 0x4a0   : > { %432 = vst.msk [vmem:[%s2254_s30 + $0x50] sm:$0xff] %vm421_vm2, %v415_v28 }
 0x4a3   : > { %v416_v38 = vpop.trf.xlu1 }
 0x4a4   : > { %433 = vst.msk [vmem:[%s2254_s30 + $0x58] sm:$0xff] %vm421_vm2, %v416_v38 }
 0x4a7   : > { %v417_v29 = vpop.trf.xlu1 }
 0x4a8   : > { %434 = vst.msk [vmem:[%s2254_s30 + $0x60] sm:$0xff] %vm421_vm2, %v417_v29 }
 0x4ab   : > { %v418_v30 = vpop.trf.xlu1 }
 0x4ac   : > { %435 = vst.msk [vmem:[%s2254_s30 + $0x68] sm:$0xff] %vm421_vm2, %v418_v30 }
 0x4af   : > { %v419_v40 = vpop.trf.xlu1 }
 0x4b0   : > { %436 = vst.msk [vmem:[%s2254_s30 + $0x70] sm:$0xff] %vm421_vm2, %v419_v40 }
 0x4b3   : > { %v420_v31 = vpop.trf.xlu1 }
 0x4b4   : > { %437 = vst.msk [vmem:[%s2254_s30 + $0x78] sm:$0xff] %vm421_vm2, %v420_v31 }
 0x4c8   : > { %v903_v32 = vpop.trf.xlu1 }
 0x4c9   : > { %1356 = vst.msk [vmem:[%s2254_s30 + $0x100] sm:$0xff] %vm421_vm2, %v903_v32 }
 0x4cc   : > { %v904_v33 = vpop.trf.xlu1 }
 0x4cd   : > { %1357 = vst.msk [vmem:[%s2254_s30 + $0x108] sm:$0xff] %vm421_vm2, %v904_v33 }
 0x4d0   : > { %v905_v34 = vpop.trf.xlu1 }
 0x4d1   : > { %1358 = vst.msk [vmem:[%s2254_s30 + $0x110] sm:$0xff] %vm421_vm2, %v905_v34 }
 0x4d4   : > { %v906_v35 = vpop.trf.xlu1 }
 0x4d5   : > { %1359 = vst.msk [vmem:[%s2254_s30 + $0x118] sm:$0xff] %vm421_vm2, %v906_v35 }
 0x4d8   : > { %v907_v39 = vpop.trf.xlu1 }
 0x4d9   : > { %1360 = vst.msk [vmem:[%s2254_s30 + $0x120] sm:$0xff] %vm421_vm2, %v907_v39 }
 0x4dc   : > { %v908_v1 = vpop.trf.xlu1 }
 0x4dd   : > { %1361 = vst.msk [vmem:[%s2254_s30 + $0x128] sm:$0xff] %vm421_vm2, %v908_v1 }
 0x4e0   : > { %v909_v41 = vpop.trf.xlu1 }
 0x4e1   : > { %1362 = vst.msk [vmem:[%s2254_s30 + $0x130] sm:$0xff] %vm421_vm2, %v909_v41 }
 0x4e4   : > { %v910_v42 = vpop.trf.xlu1 }
 0x4e5   : > { %1363 = vst.msk [vmem:[%s2254_s30 + $0x138] sm:$0xff] %vm421_vm2, %v910_v42 }
 0x4e8   : > { %v911_v48 = vpop.trf.xlu1 }
 0x4e9   : > { %1364 = vst.msk [vmem:[%s2254_s30 + $0x140] sm:$0xff] %vm421_vm2, %v911_v48 }
 0x4ec   : > { %v912_v49 = vpop.trf.xlu1 }
 0x4ed   : > { %1365 = vst.msk [vmem:[%s2254_s30 + $0x148] sm:$0xff] %vm421_vm2, %v912_v49 }
 0x4f0   : > { %v913_v50 = vpop.trf.xlu1 }
 0x4f1   : > { %1366 = vst.msk [vmem:[%s2254_s30 + $0x150] sm:$0xff] %vm421_vm2, %v913_v50 }
 0x4f4   : > { %v914_v51 = vpop.trf.xlu1 }
 0x4f5   : > { %1367 = vst.msk [vmem:[%s2254_s30 + $0x158] sm:$0xff] %vm421_vm2, %v914_v51 }
 0x4f8   : > { %v915_v52 = vpop.trf.xlu1 }
 0x4f9   : > { %1368 = vst.msk [vmem:[%s2254_s30 + $0x160] sm:$0xff] %vm421_vm2, %v915_v52 }
 0x4fc   : > { %v916_v53 = vpop.trf.xlu1 }
 0x4fd   : > { %1369 = vst.msk [vmem:[%s2254_s30 + $0x168] sm:$0xff] %vm421_vm2, %v916_v53 }
 0x500   : > { %v917_v43 = vpop.trf.xlu1 }
 0x501   : > { %1370 = vst.msk [vmem:[%s2254_s30 + $0x170] sm:$0xff] %vm421_vm2, %v917_v43 }
 0x504   : > { %v918_v54 = vpop.trf.xlu1 }
 0x505   : > { %1371 = vst.msk [vmem:[%s2254_s30 + $0x178] sm:$0xff] %vm421_vm2, %v918_v54 }
 0x508   : > { %v1152_v26 = vpop.trf.xlu1 }
 0x509   : > { %1406 = vst.msk [vmem:[%s2254_s30 + $0x180] sm:$0xff] %vm421_vm2, %v1152_v26 }
 0x50c   : > { %v1153_v55 = vpop.trf.xlu1 }
 0x50d   : > { %1407 = vst.msk [vmem:[%s2254_s30 + $0x188] sm:$0xff] %vm421_vm2, %v1153_v55 }
 0x510   : > { %v1154_v56 = vpop.trf.xlu1 }
 0x511   : > { %1408 = vst.msk [vmem:[%s2254_s30 + $0x190] sm:$0xff] %vm421_vm2, %v1154_v56 }
 0x514   : > { %v1155_v57 = vpop.trf.xlu1 }
 0x515   : > { %1409 = vst.msk [vmem:[%s2254_s30 + $0x198] sm:$0xff] %vm421_vm2, %v1155_v57 }
 0x518   : > { %v1156_v58 = vpop.trf.xlu1 }
 0x519   : > { %1410 = vst.msk [vmem:[%s2254_s30 + $0x1a0] sm:$0xff] %vm421_vm2, %v1156_v58 }
 0x51c   : > { %v1157_v59 = vpop.trf.xlu1 }
 0x51d   : > { %1411 = vst.msk [vmem:[%s2254_s30 + $0x1a8] sm:$0xff] %vm421_vm2, %v1157_v59 }
 0x520   : > { %v1158_v60 = vpop.trf.xlu1 }
 0x521   : > { %1412 = vst.msk [vmem:[%s2254_s30 + $0x1b0] sm:$0xff] %vm421_vm2, %v1158_v60 }
 0x524   : > { %v1159_v47 = vpop.trf.xlu1 }
 0x525   : > { %1413 = vst.msk [vmem:[%s2254_s30 + $0x1b8] sm:$0xff] %vm421_vm2, %v1159_v47 }
 0x528   : > { %v1160_v61 = vpop.trf.xlu1 }
 0x529   : > { %1414 = vst.msk [vmem:[%s2254_s30 + $0x1c0] sm:$0xff] %vm421_vm2, %v1160_v61 }
 0x52c   : > { %v1161_v62 = vpop.trf.xlu1 }
 0x52d   : > { %1415 = vst.msk [vmem:[%s2254_s30 + $0x1c8] sm:$0xff] %vm421_vm2, %v1161_v62 }
 0x530   : > { %v1162_v63 = vpop.trf.xlu1 }
 0x531   : > { %1416 = vst.msk [vmem:[%s2254_s30 + $0x1d0] sm:$0xff] %vm421_vm2, %v1162_v63 }
 0x534   : > { %v1163_v2 = vpop.trf.xlu1 }
 0x535   : > { %1417 = vst.msk [vmem:[%s2254_s30 + $0x1d8] sm:$0xff] %vm421_vm2, %v1163_v2 }
 0x538   : > { %v1164_v3 = vpop.trf.xlu1 }
 0x539   : > { %1418 = vst.msk [vmem:[%s2254_s30 + $0x1e0] sm:$0xff] %vm421_vm2, %v1164_v3 }
 0x53c   : > { %v1165_v4 = vpop.trf.xlu1 }
 0x53d   : > { %1419 = vst.msk [vmem:[%s2254_s30 + $0x1e8] sm:$0xff] %vm421_vm2, %v1165_v4 }
 0x540   : > { %v1166_v5 = vpop.trf.xlu1 }
 0x541   : > { %1420 = vst.msk [vmem:[%s2254_s30 + $0x1f0] sm:$0xff] %vm421_vm2, %v1166_v5 }
 0x544   : > { %v1167_v45 = vpop.trf.xlu1 }
 0x545   : > { %1421 = vst.msk [vmem:[%s2254_s30 + $0x1f8] sm:$0xff] %vm421_vm2, %v1167_v45 }
 0x546 PF: > { %s13_s12 = sadd.s32 1, %s1872_s12  }
 0x547   : > { %p10_p4 = scmp.ge.s32.totalorder %s13_s12, 4  }
 0x549   :  { %12 = sbr.rel (!%p10_p4) target bundleno = 1 (0x1), region = 68 }

</bundles_post_ra>
